<compile_context>
chip_gen: v7x
topology: tpu7x:2x2x1
jax: 0.10.0
libtpu: 0.0.40
codegen_flags: <defaults>
</compile_context>

<pallas_src>
import jax
import jax.numpy as jnp
import numpy as np
from jax.experimental import pallas as pl
from jax.experimental.pallas import tpu as pltpu


def _round_up(v, m):
    return ((v + m - 1) // m) * m


def _default_num_cores():
    """2 TensorCores only on v7x; the extra 'parallel' core axis is pure
    overhead (serial 2x loop + doubled partials) on single-TC v5e/v6e."""
    try:
        kind = jax.devices()[0].device_kind.lower()
    except Exception:
        return 1
    return 2 if ("v7" in kind or "7x" in kind) else 1


def ols_kernel(x_ref, tgt_ref, nll_ref, grad_ref, cnt_ref):
    """One batch tile. Per-core accumulators over the 'arbitrary' tile axis:
       nll[t, c]  += sum_{n: tgt[n]==t}            -log_softmax(x)[n, c]
       grad[t, c] += sum_{n: tgt[n]==t, correct n}  softmax(x)[n, c]
       cnt[0, t]  += number of correctly-predicted samples with target t
    The loss itself is the O(C^2) epilogue sum(matrix * nll)/N done in the
    wrapper, so the smoothing matrix never has to sit in VMEM."""
    step = pl.program_id(1)

    @pl.when(step == 0)
    def _init():
        nll_ref[...] = jnp.zeros_like(nll_ref)
        grad_ref[...] = jnp.zeros_like(grad_ref)
        cnt_ref[...] = jnp.zeros_like(cnt_ref)

    x = x_ref[...].astype(jnp.float32)          # [TILE_N, C]  (C unpadded)
    tgt = tgt_ref[...]                          # [TILE_N, 1] int32; pad rows: c_row sentinel
    tn, c = x.shape
    c_row = nll_ref.shape[1]                    # round_up(C, 128): lane-aligned one-hot width

    # ---- softmax / log-softmax along classes (single exp, reused) ----
    x_max = jnp.max(x, axis=-1, keepdims=True)
    shifted = x - x_max
    e = jnp.exp(shifted)                        # one EUP pass per tile
    sumexp = jnp.sum(e, axis=-1, keepdims=True)
    logprobs = shifted - jnp.log(sumexp)        # log_softmax(x)
    p = e / sumexp                              # softmax(x), reuses e

    # ---- prediction (first-index argmax, same tie-break as torch/np) ----
    class_ids = jax.lax.broadcasted_iota(jnp.int32, (tn, c), 1)
    pred = jnp.min(jnp.where(shifted >= 0.0, class_ids, c), axis=-1, keepdims=True)
    correct = (pred == tgt).astype(jnp.float32)          # [TILE_N, 1]; 0 for padded rows
    masked_p = p * correct

    # ---- one-hot of targets, built lane-aligned (no concat / no padding op);
    #      padded batch rows carry tgt == c_row (out of iota range) -> zero row ----
    row_ids = jax.lax.broadcasted_iota(jnp.int32, (tn, c_row), 1)
    onehot = (row_ids == tgt).astype(jnp.float32)        # [TILE_N, c_row]

    # ---- scatter-add by label == batch-contraction matmuls on the MXU ----
    dn = (((0,), (0,)), ((), ()))                        # contract the batch dim
    nll_ref[...] += jax.lax.dot_general(
        onehot, -logprobs, dn, preferred_element_type=jnp.float32)[None]
    grad_ref[...] += jax.lax.dot_general(
        onehot, masked_p, dn, preferred_element_type=jnp.float32)[None]

    # ---- exact per-class correct counts (lane-dense [1, c_row] row vector) ----
    cnt_ref[...] += jnp.sum(onehot * correct, axis=0, keepdims=True)[None]


def ols_forward(x, target, matrix, *, tile_n=None, num_cores=None,
                vmem_limit_bytes=None):
    """Forward pass of OnlineLabelSmoothing (training=True).

    Returns (mean_loss scalar, grad_increment [C, C], count_increment [C, 1]).
    The caller adds the increments to the persistent grad/count buffers."""
    n, c = x.shape
    c_row = _round_up(c, 128)                   # lane-aligned target-class (row) axis

    if num_cores is None:
        num_cores = _default_num_cores()

    rows_needed = -(-n // num_cores)            # ceil(n / num_cores)
    if tile_n is None:
        # ~1 MiB of f32 logits per tile (>=512 KiB tiles reach ~85% of the HBM
        # roofline), clamped to [8, 1024] and to the rows actually available.
        sweet = _round_up(max((1 << 20) // (4 * c), 1), 8)
        tile_n = max(8, min(1024, sweet, _round_up(rows_needed, 8)))
    tile_n = max(8, _round_up(tile_n, 8))

    num_tiles = max(1, -(-rows_needed // tile_n))
    n_pad = num_cores * num_tiles * tile_n

    # ---- batch padding only; the class dim stays at its native width/dtype.
    #      Padded rows get an out-of-range target -> their one-hot row is 0. ----
    tgt_flat = target.reshape(-1).astype(jnp.int32)
    if n_pad != n:
        x_in = jnp.concatenate([x, jnp.zeros((n_pad - n, c), x.dtype)], axis=0)
        tgt_flat = jnp.concatenate(
            [tgt_flat, jnp.full((n_pad - n,), c_row, jnp.int32)], axis=0)
    else:
        x_in = x
    tgt_in = tgt_flat.reshape(n_pad, 1)

    if vmem_limit_bytes is None:
        # Generous static footprint: double-buffered input tiles + resident
        # per-core output accumulators + f32 temporaries + compiler scratch.
        lane = _round_up(c, 128)
        in_bytes = 2 * tile_n * lane * (x.dtype.itemsize + 4)      # x + tgt tiles
        out_bytes = 2 * (2 * c_row * lane + 8 * c_row) * 4         # nll + grad + cnt
        tmp_bytes = 12 * tile_n * max(lane, c_row) * 4
        vmem_limit_bytes = int(min(max(in_bytes + out_bytes + tmp_bytes + (4 << 20),
                                       16 << 20), 64 << 20))

    out_shapes = (
        jax.ShapeDtypeStruct((num_cores, c_row, c), jnp.float32),   # nll partials
        jax.ShapeDtypeStruct((num_cores, c_row, c), jnp.float32),   # grad partials
        jax.ShapeDtypeStruct((num_cores, 1, c_row), jnp.float32),   # count partials
    )

    fn = pl.pallas_call(
        ols_kernel,
        out_shape=out_shapes,
        grid=(num_cores, num_tiles),
        in_specs=[
            # x: one batch tile per grid step, pipelined (class dim unpadded).
            pl.BlockSpec((tile_n, c), lambda ci, ti: (ci * num_tiles + ti, 0)),
            # target: matching batch tile.
            pl.BlockSpec((tile_n, 1), lambda ci, ti: (ci * num_tiles + ti, 0)),
        ],
        out_specs=(
            # per-core resident accumulators over the "arbitrary" batch axis.
            pl.BlockSpec((1, c_row, c), lambda ci, ti: (ci, 0, 0)),
            pl.BlockSpec((1, c_row, c), lambda ci, ti: (ci, 0, 0)),
            pl.BlockSpec((1, 1, c_row), lambda ci, ti: (ci, 0, 0)),
        ),
        compiler_params=pltpu.CompilerParams(
            dimension_semantics=("parallel", "arbitrary"),
            vmem_limit_bytes=vmem_limit_bytes),
    )
    nll_p, grad_p, cnt_p = fn(x_in, tgt_in)

    # Tiny O(C^2) epilogue in XLA; matrix never enters kernel VMEM.
    nll = jnp.sum(nll_p, axis=0)[:c, :]                       # [C, C]
    loss = jnp.sum(matrix.astype(jnp.float32) * nll) / n      # mean over real batch
    grad_inc = jnp.sum(grad_p, axis=0)[:c, :]                 # [C, C]
    cnt_inc = jnp.sum(cnt_p, axis=0)[0, :c].reshape(c, 1)     # [C, 1]
    return loss, grad_inc, cnt_inc


def ols_forward_ref(x, target, matrix):
    """Pure-JAX reference mirroring the PyTorch forward (training=True)."""
    n, c = x.shape
    logprobs = jax.nn.log_softmax(x, axis=-1)
    softlabel = matrix[target]
    loss = jnp.sum(-softlabel * logprobs, axis=-1).mean()
    p = jax.nn.softmax(x, axis=1)
    pred = jnp.argmax(p, axis=1)
    correct = (pred == target)
    grad_inc = jnp.zeros((c, c), jnp.float32).at[target].add(
        p * correct[:, None].astype(jnp.float32))
    cnt_inc = jnp.zeros((c, 1), jnp.float32).at[target, 0].add(
        correct.astype(jnp.float32))
    return loss, grad_inc, cnt_inc


if __name__ == "__main__":
    num_classes = 10
    batch = 8

    key = jax.random.PRNGKey(0)
    kx, km, kt = jax.random.split(key, 3)

    # Logits and integer targets.
    x = jax.random.normal(kx, (batch, num_classes), dtype=jnp.float32)
    target = jax.random.randint(kt, (batch,), 0, num_classes, dtype=jnp.int32)

    # Module buffers. In PyTorch __init__ `matrix` starts at zeros; use a
    # row-stochastic matrix (what `update()` would produce) so the loss path is
    # exercised. grad/count start at zeros as in __init__.
    matrix = jax.nn.softmax(
        jax.random.normal(km, (num_classes, num_classes), dtype=jnp.float32), axis=-1)
    grad_buf = jnp.zeros((num_classes, num_classes), jnp.float32)
    count_buf = jnp.zeros((num_classes, 1), jnp.float32)

    loss, grad_inc, cnt_inc = ols_forward(x, target, matrix)
    jax.block_until_ready((loss, grad_inc, cnt_inc))

    # Apply training-mode side effects (self.grad += ..., self.count += ...).
    grad_buf = grad_buf + grad_inc
    count_buf = count_buf + cnt_inc

    # Verify against the pure-JAX reference.
    loss_r, grad_r, cnt_r = ols_forward_ref(x, target, matrix)
    np.testing.assert_allclose(np.asarray(loss), np.asarray(loss_r), rtol=1e-5, atol=1e-5)
    np.testing.assert_allclose(np.asarray(grad_inc), np.asarray(grad_r), rtol=1e-5, atol=1e-5)
    np.testing.assert_allclose(np.asarray(cnt_inc), np.asarray(cnt_r), rtol=1e-5, atol=1e-5)

    print("KERNEL_OK")
</pallas_src>

<mosaic_0001>
module attributes {stable_mosaic.version = 11 : i64} {
  func.func @ols_kernel(%arg0: i32, %arg1: i32, %arg2: memref<8x10xf32, #tpu.memory_space<vmem>>, %arg3: memref<8x1xi32, #tpu.memory_space<vmem>>, %arg4: memref<1x128x10xf32, #tpu.memory_space<vmem>>, %arg5: memref<1x128x10xf32, #tpu.memory_space<vmem>>, %arg6: memref<1x1x128xf32, #tpu.memory_space<vmem>>) attributes {dimension_semantics = [#tpu.dimension_semantics<parallel>, #tpu.dimension_semantics<arbitrary>], iteration_bounds = array<i64: 1, 1>, scalar_prefetch = 0 : i64, scratch_operands = 0 : i64, tpu.core_type = #tpu.core_type<tc>, window_params = [{transform_indices = @transform_0, window_bounds = array<i64: 8, 10>}, {transform_indices = @transform_1, window_bounds = array<i64: 8, 1>}, {transform_indices = @transform_2, window_bounds = array<i64: 1, 128, 10>}, {transform_indices = @transform_3, window_bounds = array<i64: 1, 128, 10>}, {transform_indices = @transform_4, window_bounds = array<i64: 1, 1, 128>}]} {
    %c0_i32 = arith.constant 0 : i32
    %0 = arith.cmpi eq, %arg1, %c0_i32 : i32
    %1 = arith.extui %0 : i1 to i32
    %c0_i32_0 = arith.constant 0 : i32
    %2 = arith.cmpi ne, %1, %c0_i32_0 : i32
    scf.if %2 {
      %cst_29 = arith.constant 0.000000e+00 : f32
      %54 = vector.broadcast %cst_29 : f32 to vector<1x128x10xf32>
      %c0_30 = arith.constant 0 : index
      %c0_31 = arith.constant 0 : index
      %c0_32 = arith.constant 0 : index
      %55 = vector.load %arg4[%c0_30, %c0_31, %c0_32] : memref<1x128x10xf32, #tpu.memory_space<vmem>>, vector<1x128x10xf32>
      tpu.vector_store %arg4[%c0_30, %c0_31, %c0_32], %54 {strides = array<i32>} : memref<1x128x10xf32, #tpu.memory_space<vmem>>, vector<1x128x10xf32>,
      %cst_33 = arith.constant 0.000000e+00 : f32
      %56 = vector.broadcast %cst_33 : f32 to vector<1x128x10xf32>
      %c0_34 = arith.constant 0 : index
      %c0_35 = arith.constant 0 : index
      %c0_36 = arith.constant 0 : index
      %57 = vector.load %arg5[%c0_34, %c0_35, %c0_36] : memref<1x128x10xf32, #tpu.memory_space<vmem>>, vector<1x128x10xf32>
      tpu.vector_store %arg5[%c0_34, %c0_35, %c0_36], %56 {strides = array<i32>} : memref<1x128x10xf32, #tpu.memory_space<vmem>>, vector<1x128x10xf32>,
      %cst_37 = arith.constant 0.000000e+00 : f32
      %58 = vector.broadcast %cst_37 : f32 to vector<1x1x128xf32>
      %c0_38 = arith.constant 0 : index
      %c0_39 = arith.constant 0 : index
      %c0_40 = arith.constant 0 : index
      %59 = vector.load %arg6[%c0_38, %c0_39, %c0_40] : memref<1x1x128xf32, #tpu.memory_space<vmem>>, vector<1x1x128xf32>
      tpu.vector_store %arg6[%c0_38, %c0_39, %c0_40], %58 {strides = array<i32>} : memref<1x1x128xf32, #tpu.memory_space<vmem>>, vector<1x1x128xf32>,
    } else {
    }
    %c0 = arith.constant 0 : index
    %c0_1 = arith.constant 0 : index
    %3 = vector.load %arg2[%c0, %c0_1] : memref<8x10xf32, #tpu.memory_space<vmem>>, vector<8x10xf32>
    %c0_2 = arith.constant 0 : index
    %c0_3 = arith.constant 0 : index
    %4 = vector.load %arg3[%c0_2, %c0_3] : memref<8x1xi32, #tpu.memory_space<vmem>>, vector<8x1xi32>
    %cst = arith.constant dense<0xFF800000> : vector<8xf32>
    %5 = vector.multi_reduction <maximumf>, %3, %cst [1] : vector<8x10xf32> to vector<8xf32>
    %6 = vector.shape_cast %5 : vector<8xf32> to vector<8x1xf32>
    %7 = vector.broadcast %6 : vector<8x1xf32> to vector<8x10xf32>
    %8 = arith.subf %3, %7 : vector<8x10xf32>
    %9 = math.exp %8 : vector<8x10xf32>
    %cst_4 = arith.constant dense<0.000000e+00> : vector<8xf32>
    %10 = vector.multi_reduction <add>, %9, %cst_4 [1] : vector<8x10xf32> to vector<8xf32>
    %11 = vector.shape_cast %10 : vector<8xf32> to vector<8x1xf32>
    %12 = math.log %11 : vector<8x1xf32>
    %13 = vector.broadcast %12 : vector<8x1xf32> to vector<8x10xf32>
    %14 = arith.subf %8, %13 : vector<8x10xf32>
    %15 = vector.broadcast %11 : vector<8x1xf32> to vector<8x10xf32>
    %16 = arith.divf %9, %15 : vector<8x10xf32>
    %17 = tpu.iota {dimensions = array<i32: 1>} : vector<8x10xi32>
    %cst_5 = arith.constant 0.000000e+00 : f32
    %18 = vector.broadcast %cst_5 : f32 to vector<8x10xf32>
    %19 = arith.cmpf oge, %8, %18 : vector<8x10xf32>
    %c10_i32 = arith.constant 10 : i32
    %20 = vector.broadcast %c10_i32 : i32 to vector<8x10xi32>
    %21 = arith.select %19, %17, %20 : vector<8x10xi1>, vector<8x10xi32>
    %cst_6 = arith.constant dense<2147483647> : vector<8xi32>
    %22 = vector.multi_reduction <minsi>, %21, %cst_6 [1] : vector<8x10xi32> to vector<8xi32>
    %23 = vector.shape_cast %22 : vector<8xi32> to vector<8x1xi32>
    %24 = arith.cmpi eq, %23, %4 : vector<8x1xi32>
    %25 = arith.extui %24 : vector<8x1xi1> to vector<8x1xi32>
    %26 = arith.sitofp %25 : vector<8x1xi32> to vector<8x1xf32>
    %27 = vector.broadcast %26 : vector<8x1xf32> to vector<8x10xf32>
    %28 = arith.mulf %16, %27 : vector<8x10xf32>
    %29 = tpu.iota {dimensions = array<i32: 1>} : vector<8x128xi32>
    %30 = vector.broadcast %4 : vector<8x1xi32> to vector<8x128xi32>
    %31 = arith.cmpi eq, %29, %30 : vector<8x128xi32>
    %32 = arith.extui %31 : vector<8x128xi1> to vector<8x128xi32>
    %33 = arith.sitofp %32 : vector<8x128xi32> to vector<8x128xf32>
    %c0_7 = arith.constant 0 : index
    %c0_8 = arith.constant 0 : index
    %c0_9 = arith.constant 0 : index
    %34 = vector.load %arg4[%c0_7, %c0_8, %c0_9] : memref<1x128x10xf32, #tpu.memory_space<vmem>>, vector<1x128x10xf32>
    %cst_10 = arith.constant 0.000000e+00 : f32
    %35 = vector.broadcast %cst_10 : f32 to vector<8x10xf32>
    %36 = arith.subf %35, %14 : vector<8x10xf32>
    %cst_11 = arith.constant dense<0.000000e+00> : vector<128x10xf32>
    %37 = tpu.matmul %33, %36, %cst_11 {dimension_numbers = #tpu.dot_dimension_numbers<[0], [0], [1], [1], [0, 1, 1, 1], [], []>} : vector<8x128xf32>, vector<8x10xf32>, vector<128x10xf32> -> vector<128x10xf32>
    %38 = vector.shape_cast %37 : vector<128x10xf32> to vector<1x128x10xf32>
    %39 = arith.addf %34, %38 : vector<1x128x10xf32>
    %c0_12 = arith.constant 0 : index
    %c0_13 = arith.constant 0 : index
    %c0_14 = arith.constant 0 : index
    %40 = vector.load %arg4[%c0_12, %c0_13, %c0_14] : memref<1x128x10xf32, #tpu.memory_space<vmem>>, vector<1x128x10xf32>
    tpu.vector_store %arg4[%c0_12, %c0_13, %c0_14], %39 {strides = array<i32>} : memref<1x128x10xf32, #tpu.memory_space<vmem>>, vector<1x128x10xf32>,
    %c0_15 = arith.constant 0 : index
    %c0_16 = arith.constant 0 : index
    %c0_17 = arith.constant 0 : index
    %41 = vector.load %arg5[%c0_15, %c0_16, %c0_17] : memref<1x128x10xf32, #tpu.memory_space<vmem>>, vector<1x128x10xf32>
    %cst_18 = arith.constant dense<0.000000e+00> : vector<128x10xf32>
    %42 = tpu.matmul %33, %28, %cst_18 {dimension_numbers = #tpu.dot_dimension_numbers<[0], [0], [1], [1], [0, 1, 1, 1], [], []>} : vector<8x128xf32>, vector<8x10xf32>, vector<128x10xf32> -> vector<128x10xf32>
    %43 = vector.shape_cast %42 : vector<128x10xf32> to vector<1x128x10xf32>
    %44 = arith.addf %41, %43 : vector<1x128x10xf32>
    %c0_19 = arith.constant 0 : index
    %c0_20 = arith.constant 0 : index
    %c0_21 = arith.constant 0 : index
    %45 = vector.load %arg5[%c0_19, %c0_20, %c0_21] : memref<1x128x10xf32, #tpu.memory_space<vmem>>, vector<1x128x10xf32>
    tpu.vector_store %arg5[%c0_19, %c0_20, %c0_21], %44 {strides = array<i32>} : memref<1x128x10xf32, #tpu.memory_space<vmem>>, vector<1x128x10xf32>,
    %c0_22 = arith.constant 0 : index
    %c0_23 = arith.constant 0 : index
    %c0_24 = arith.constant 0 : index
    %46 = vector.load %arg6[%c0_22, %c0_23, %c0_24] : memref<1x1x128xf32, #tpu.memory_space<vmem>>, vector<1x1x128xf32>
    %47 = vector.broadcast %26 : vector<8x1xf32> to vector<8x128xf32>
    %48 = arith.mulf %33, %47 : vector<8x128xf32>
    %cst_25 = arith.constant dense<0.000000e+00> : vector<128xf32>
    %49 = vector.multi_reduction <add>, %48, %cst_25 [0] : vector<8x128xf32> to vector<128xf32>
    %50 = vector.shape_cast %49 : vector<128xf32> to vector<1x128xf32>
    %51 = vector.shape_cast %50 : vector<1x128xf32> to vector<1x1x128xf32>
    %52 = arith.addf %46, %51 : vector<1x1x128xf32>
    %c0_26 = arith.constant 0 : index
    %c0_27 = arith.constant 0 : index
    %c0_28 = arith.constant 0 : index
    %53 = vector.load %arg6[%c0_26, %c0_27, %c0_28] : memref<1x1x128xf32, #tpu.memory_space<vmem>>, vector<1x1x128xf32>
    tpu.vector_store %arg6[%c0_26, %c0_27, %c0_28], %52 {strides = array<i32>} : memref<1x1x128xf32, #tpu.memory_space<vmem>>, vector<1x1x128xf32>,
    return
  }
  func.func @transform_0(%arg0: i32, %arg1: i32) -> (i32, i32) {
    %c1_i32 = arith.constant 1 : i32
    %0 = arith.muli %arg0, %c1_i32 : i32
    %1 = arith.addi %0, %arg1 : i32
    %c0_i32 = arith.constant 0 : i32
    %c0_i32_0 = arith.constant 0 : i32
    return %1, %c0_i32 : i32, i32
  }
  func.func @transform_1(%arg0: i32, %arg1: i32) -> (i32, i32) {
    %c1_i32 = arith.constant 1 : i32
    %0 = arith.muli %arg0, %c1_i32 : i32
    %1 = arith.addi %0, %arg1 : i32
    %c0_i32 = arith.constant 0 : i32
    %c0_i32_0 = arith.constant 0 : i32
    return %1, %c0_i32 : i32, i32
  }
  func.func @transform_2(%arg0: i32, %arg1: i32) -> (i32, i32, i32) {
    %c0_i32 = arith.constant 0 : i32
    %c0_i32_0 = arith.constant 0 : i32
    %c0_i32_1 = arith.constant 0 : i32
    return %arg0, %c0_i32, %c0_i32_0 : i32, i32, i32
  }
  func.func @transform_3(%arg0: i32, %arg1: i32) -> (i32, i32, i32) {
    %c0_i32 = arith.constant 0 : i32
    %c0_i32_0 = arith.constant 0 : i32
    %c0_i32_1 = arith.constant 0 : i32
    return %arg0, %c0_i32, %c0_i32_0 : i32, i32, i32
  }
  func.func @transform_4(%arg0: i32, %arg1: i32) -> (i32, i32, i32) {
    %c0_i32 = arith.constant 0 : i32
    %c0_i32_0 = arith.constant 0 : i32
    %c0_i32_1 = arith.constant 0 : i32
    return %arg0, %c0_i32, %c0_i32_0 : i32, i32, i32
  }
}

</mosaic_0001>

<bundles_post_ra>
// kernel: tpu_custom_call.1
= control target key start
LH: loop header
LB: loop body
LE: loop exit
PB: predicated region body
PF: predicated region fallthrough
CT: control target
= control target key end

     0   :  { %vm53_vm0 = vcmask 80896   ;;  %s1246_s0 = inlined_call_operand.vmem [shape: f32[8,10], index: 0, kind: input, shape index: {}]   ;;  %s1247_s1 = inlined_call_operand.vmem [shape: s32[8,1], index: 1, kind: input, shape index: {}]   ;;  %s1248_s2 = inlined_call_operand.vmem [shape: f32[1,128,10], index: 2, kind: output, shape index: {0}]   ;;  %s1249_s3 = inlined_call_operand.vmem [shape: f32[1,128,10], index: 3, kind: output, shape index: {1}]   ;;  %s1250_s4 = inlined_call_operand.hbm [shape: f32[1,1,128], index: 4, kind: output, shape index: {2}]  }
   0x1   :  { %v87_v0 = vld [vmem:[%s1246_s0] sm:$0xff] }
   0x2   :  { %10 = vsyncpa [#allocation3], 0  ;;  %v90_v1 = vsel %vm53_vm0, %v87_v0, -inf  ;;  %v104_v2 = vlaneseq  ;;  %v805_v13 = vmov 0   ;;  %v88_v19 = vld [vmem:[%s1247_s1] sm:$0xff]  ;;  %v806_v22 = vmov 0.0  }
   0x3   :  { %91 = vmax.xlane.f32.xlu0 %v90_v1  ;;  %773 = vset.pattern.permute.xlu1 %v805_v13  ;;  %54 = vst.msk [vmem:[%s1248_s2] sm:$0xff] %vm53_vm0, %v806_v22  ;;  %55 = vst.msk [vmem:[%s1248_s2 + $0x8] sm:$0xff] %vm53_vm0, %v806_v22  ;;  %vm187_vm5 = vcmask 64512   ;;  %s807_s25 = smov [#allocation2]  }
   0x4   :  { %v837_v4 = vand.u32 127, %v104_v2  ;;  %774 = vset.pattern.permute.xlu0 %v805_v13  ;;  %56 = vst.msk [vmem:[%s1248_s2 + $0x10] sm:$0xff] %vm53_vm0, %v806_v22  ;;  %57 = vst.msk [vmem:[%s1248_s2 + $0x18] sm:$0xff] %vm53_vm0, %v806_v22  ;;  %s626_s26 = sshll.u32 %s807_s25, 4  ;;  %s627_s26 = int_to_ptr.vmem [resolvable:$true] %s626_s26 }
   0x5   :  { %58 = vst.msk [vmem:[%s1248_s2 + $0x20] sm:$0xff] %vm53_vm0, %v806_v22  ;;  %59 = vst.msk [vmem:[%s1248_s2 + $0x28] sm:$0xff] %vm53_vm0, %v806_v22  ;;  %s781_s27 = scalar_lea.vmem %s627_s26, 16  ;;  %s785_s28 = scalar_lea.vmem %s627_s26, 32 }
   0x6   :  { %60 = vst.msk [vmem:[%s1248_s2 + $0x30] sm:$0xff] %vm53_vm0, %v806_v22  ;;  %61 = vst.msk [vmem:[%s1248_s2 + $0x38] sm:$0xff] %vm53_vm0, %v806_v22  ;;  %p782_p0 = scmp.ne.s32.totalorder %s627_s26, %s781_s27  ;;  %p786_p1 = scmp.lt.s32.totalorder %s627_s26, %s627_s26 }
   0x7   :  { %62 = vst.msk [vmem:[%s1248_s2 + $0x40] sm:$0xff] %vm53_vm0, %v806_v22  ;;  %63 = vst.msk [vmem:[%s1248_s2 + $0x48] sm:$0xff] %vm53_vm0, %v806_v22  ;;  %p787_p2 = scmp.lt.s32.totalorder %s785_s28, %s781_s27 }
   0x8   :  { %64 = vst.msk [vmem:[%s1248_s2 + $0x50] sm:$0xff] %vm53_vm0, %v806_v22  ;;  %65 = vst.msk [vmem:[%s1248_s2 + $0x58] sm:$0xff] %vm53_vm0, %v806_v22 }
   0x9   :  { %66 = vst.msk [vmem:[%s1248_s2 + $0x60] sm:$0xff] %vm53_vm0, %v806_v22  ;;  %67 = vst.msk [vmem:[%s1248_s2 + $0x68] sm:$0xff] %vm53_vm0, %v806_v22  ;;  %p788_p3 = por %p787_p2, %p786_p1 }
   0xa   :  { %68 = vst.msk [vmem:[%s1248_s2 + $0x70] sm:$0xff] %vm53_vm0, %v806_v22  ;;  %69 = vst.msk [vmem:[%s1248_s2 + $0x78] sm:$0xff] %vm53_vm0, %v806_v22 }
   0xb   :  { %70 = vst.msk [vmem:[%s1249_s3] sm:$0xff] %vm53_vm0, %v806_v22  ;;  %71 = vst.msk [vmem:[%s1249_s3 + $0x8] sm:$0xff] %vm53_vm0, %v806_v22  ;;  %p789_p4 = pnand %p788_p3, %p782_p0 }
   0xc   :  { %72 = vst.msk [vmem:[%s1249_s3 + $0x10] sm:$0xff] %vm53_vm0, %v806_v22  ;;  %73 = vst.msk [vmem:[%s1249_s3 + $0x18] sm:$0xff] %vm53_vm0, %v806_v22 }
   0xd   :  { %74 = vst.msk [vmem:[%s1249_s3 + $0x20] sm:$0xff] %vm53_vm0, %v806_v22  ;;  %75 = vst.msk [vmem:[%s1249_s3 + $0x28] sm:$0xff] %vm53_vm0, %v806_v22 }
   0xe   :  { %76 = vst.msk [vmem:[%s1249_s3 + $0x30] sm:$0xff] %vm53_vm0, %v806_v22  ;;  %77 = vst.msk [vmem:[%s1249_s3 + $0x38] sm:$0xff] %vm53_vm0, %v806_v22 }
   0xf   :  { %78 = vst.msk [vmem:[%s1249_s3 + $0x40] sm:$0xff] %vm53_vm0, %v806_v22  ;;  %79 = vst.msk [vmem:[%s1249_s3 + $0x48] sm:$0xff] %vm53_vm0, %v806_v22 }
  0x10   :  { %80 = vst.msk [vmem:[%s1249_s3 + $0x50] sm:$0xff] %vm53_vm0, %v806_v22  ;;  %81 = vst.msk [vmem:[%s1249_s3 + $0x58] sm:$0xff] %vm53_vm0, %v806_v22 }
  0x11   :  { %82 = vst.msk [vmem:[%s1249_s3 + $0x60] sm:$0xff] %vm53_vm0, %v806_v22  ;;  %83 = vst.msk [vmem:[%s1249_s3 + $0x68] sm:$0xff] %vm53_vm0, %v806_v22 }
  0x12   :  { %84 = vst.msk [vmem:[%s1249_s3 + $0x70] sm:$0xff] %vm53_vm0, %v806_v22  ;;  %85 = vst.msk [vmem:[%s1249_s3 + $0x78] sm:$0xff] %vm53_vm0, %v806_v22 }
  0x13   :  { %86 = vst [vmem:[#allocation2] sm:$0x1] %v806_v22 }
  0x1a   :  { %v606_v46 = vld [vmem:[#allocation2] sm:$0x1] }
  0x90   :  { %v92_v3 = vpop.xlane.xlu0 %91 }
  0x91   :  { %v93_v5 = vsub.f32 %v87_v0, %v92_v3 }
  0x93   :  { %v94_v6 = vmul.f32 1.442695, %v93_v5  ;;  %vm106_vm1 = vcmp.ge.f32.partialorder %v93_v5, 0.0 }
  0x94   :  { %v107_v7 = vsel %vm106_vm1, %v837_v4, 10 }
  0x95   :  { %775 = vpow2.f32 %v94_v6  ;;  %v108_v8 = vsel %vm53_vm0, %v107_v7, 2147483647 }
  0x96   :  { %v110_v9 = vshra.s32 %v108_v8, 16  ;;  %v109_v14 = vand.u32 65535, %v108_v8 }
  0x98   :  { %v112_v10 = vcvt.s32.f32 %v110_v9  ;;  %v111_v16 = vcvt.s32.f32 %v109_v14 }
  0x9a   :  { %113 = vmin.xlane.f32.xlu0 %v112_v10 }
  0x9f   :  { %v841_v11 = vpop.eup %775 }
  0xa0   :  { %v96_v12 = vsel %vm53_vm0, %v841_v11, 0.0 }
  0xa1   :  { %97 = vadd.xlane.f32.xlu0 %v96_v12 }
 0x127   :  { %v114_v15 = vpop.xlane.xlu0 %113 }
 0x128   :  { %vm115_vm2 = vcmp.eq.f32.partialorder %v112_v10, %v114_v15  ;;  %v120_v25 = vcvt.f32.s32 %v114_v15 }
 0x129   :  { %v116_v17 = vsel %vm115_vm2, %v111_v16, inf }
 0x12a   :  { %117 = vmin.xlane.f32.xlu1 %v116_v17  ;;  %v121_v27 = vshll.u32 %v120_v25, 16 }
 0x12e   :  { %v98_v18 = vpop.xlane.xlu0 %97 }
 0x12f   :  { %777 = vlog2.f32 %v98_v18 }
 0x130   :  { %779 = vrcp.f32 %v98_v18 }
 0x139   :  { %v778_v20 = vpop.eup %777 }
 0x13a   :  { %v100_v21 = vmul.f32 0.6931472, %v778_v20  ;;  %v780_v33 = vpop.eup %779 }
 0x13b   :  { %133 = vperm.xlu1 %773, %v88_v19   ;;  %v103_v34 = vmul.f32 %v780_v33, %v841_v11 }
 0x13c   :  { %v101_v23 = vsub.f32 %v93_v5, %v100_v21 }
 0x13e   :  { %v154_v24 = vsub.f32 0.0, %v101_v23 }
 0x140   :  { %718 = vmatprep.subr.mxu0 %v154_v24 }
 0x141   :  { %719 = vmatpush3.msra.mxu0 %v154_v24 }
 0x1b7   :  { %v118_v26 = vpop.xlane.xlu1 %117 }
 0x1b8   :  { %v119_v28 = vcvt.f32.s32 %v118_v26 }
 0x1ba   :  { %v122_v29 = vadd.s32 %v121_v27, %v119_v28 }
 0x1bb   :  { %v134_v30 = vpop.permute.xlu1 %133 }
 0x1bc   :  { %vm135_vm3 = vcmp.eq.s32.totalorder %v837_v4, %v134_v30  ;;  %vm123_vm4 = vcmp.eq.s32.totalorder %v122_v29, %v88_v19 }
 0x1bd   :  { %v651_v31 = vsel %vm135_vm3, 1.0, %v806_v22  ;;  %v650_v32 = vsel %vm123_vm4, 1.0, %v806_v22 }
 0x1be   :  { %155 = vxpose.xlu1.b32.start.end [1/1] (short) %v651_v31, 128  ;;  %128 = vperm.xlu0 %774, %v650_v32  }
 0x23d   :  { %v129_v35 = vpop.permute.xlu0 %128 }
 0x23e   :  { %v131_v36 = vmul.f32 %v129_v35, %v103_v34  ;;  %v607_v37 = vmul.f32 %v651_v31, %v129_v35  ;;  %v171_v38 = vpop.trf.xlu1 }
 0x23f   :  { %720 = vmatprep.mubr.msk.f32.mxu0 %vm187_vm5, %v171_v38  ;;  %746 = vmatprep.mubr.msk.f32.mxu1 %vm187_vm5, %v171_v38 }
 0x240   :  { %v608_v39 = vrot.slane %v607_v37, 4  ;;  %744 = vmatprep.subr.mxu1 %v131_v36 }
 0x241   :  { %745 = vmatpush3.msra.mxu1 %v131_v36 }
 0x242   :  { %v609_v40 = vadd.f32 %v608_v39, %v607_v37  ;;  %v172_v41 = vpop.trf.xlu1 }
 0x243   :  { %721 = vmatmul.mubr.msk.f32.vlgmr.msra.gmra.mrb[0].mxu0 %vm187_vm5, %v172_v41  ;;  %747 = vmatmul.mubr.msk.f32.vlgmr.msra.gmra.mrb[0].mxu1 %vm187_vm5, %v172_v41 }
 0x244   :  { %v610_v42 = vrot.slane %v609_v40, 2 }
 0x246   :  { %v611_v43 = vadd.f32 %v610_v42, %v609_v40  ;;  %v173_v44 = vpop.trf.xlu1 }
 0x247   :  { %723 = vmatprep.mubr.msk.f32.mxu0 %vm187_vm5, %v173_v44  ;;  %749 = vmatprep.mubr.msk.f32.mxu1 %vm187_vm5, %v173_v44 }
 0x248   :  { %v612_v45 = vrot.slane %v611_v43, 1 }
 0x24a   :  { %v613_v47 = vadd.f32 %v612_v45, %v611_v43  ;;  %v174_v48 = vpop.trf.xlu1 }
 0x24b   :  { %724 = vmatmul.mubr.msk.f32.gmra.mrb[2].mxu0 %vm187_vm5, %v174_v48  ;;  %750 = vmatmul.mubr.msk.f32.gmra.mrb[2].mxu1 %vm187_vm5, %v174_v48 }
 0x24c   :  { %v614_v49 = vadd.f32 %v613_v47, %v606_v46 }
 0x24e   :  { %v175_v50 = vpop.trf.xlu1  ;;  %615 = vst [vmem:[#allocation2] sm:$0x1] %v614_v49 }
 0x24f   :  { %726 = vmatprep.mubr.msk.f32.mxu0 %vm187_vm5, %v175_v50  ;;  %752 = vmatprep.mubr.msk.f32.mxu1 %vm187_vm5, %v175_v50 }
 0x252   :  { %v176_v51 = vpop.trf.xlu1 }
 0x253   :  { %727 = vmatmul.mubr.msk.f32.gmra.mrb[4].mxu0 %vm187_vm5, %v176_v51  ;;  %753 = vmatmul.mubr.msk.f32.gmra.mrb[4].mxu1 %vm187_vm5, %v176_v51 }
 0x256   :  { %v177_v52 = vpop.trf.xlu1 }
 0x257   :  { %729 = vmatprep.mubr.msk.f32.mxu0 %vm187_vm5, %v177_v52  ;;  %755 = vmatprep.mubr.msk.f32.mxu1 %vm187_vm5, %v177_v52 }
 0x25a   :  { %v178_v53 = vpop.trf.xlu1 }
 0x25b   :  { %730 = vmatmul.mubr.msk.f32.gmra.mrb[6].mxu0 %vm187_vm5, %v178_v53  ;;  %756 = vmatmul.mubr.msk.f32.gmra.mrb[6].mxu1 %vm187_vm5, %v178_v53 }
 0x25e   :  { %v179_v54 = vpop.trf.xlu1 }
 0x25f   :  { %732 = vmatprep.mubr.msk.f32.mxu0 %vm187_vm5, %v179_v54  ;;  %758 = vmatprep.mubr.msk.f32.mxu1 %vm187_vm5, %v179_v54 }
 0x262   :  { %v180_v55 = vpop.trf.xlu1 }
 0x263   :  { %733 = vmatmul.mubr.msk.f32.gmra.mrb[8].mxu0 %vm187_vm5, %v180_v55  ;;  %759 = vmatmul.mubr.msk.f32.gmra.mrb[8].mxu1 %vm187_vm5, %v180_v55 }
 0x266   :  { %v181_v56 = vpop.trf.xlu1 }
 0x267   :  { %735 = vmatprep.mubr.msk.f32.mxu0 %vm187_vm5, %v181_v56  ;;  %761 = vmatprep.mubr.msk.f32.mxu1 %vm187_vm5, %v181_v56 }
 0x26a   :  { %v182_v57 = vpop.trf.xlu1 }
 0x26b   :  { %736 = vmatmul.mubr.msk.f32.gmra.mrb[10].mxu0 %vm187_vm5, %v182_v57  ;;  %762 = vmatmul.mubr.msk.f32.gmra.mrb[10].mxu1 %vm187_vm5, %v182_v57 }
 0x26e   :  { %v183_v58 = vpop.trf.xlu1 }
 0x26f   :  { %738 = vmatprep.mubr.msk.f32.mxu0 %vm187_vm5, %v183_v58  ;;  %764 = vmatprep.mubr.msk.f32.mxu1 %vm187_vm5, %v183_v58 }
 0x272   :  { %v184_v59 = vpop.trf.xlu1 }
 0x273   :  { %739 = vmatmul.mubr.msk.f32.gmra.mrb[12].mxu0 %vm187_vm5, %v184_v59  ;;  %765 = vmatmul.mubr.msk.f32.gmra.mrb[12].mxu1 %vm187_vm5, %v184_v59 }
 0x276   :  { %v185_v60 = vpop.trf.xlu1 }
 0x277   :  { %741 = vmatprep.mubr.msk.f32.mxu0 %vm187_vm5, %v185_v60  ;;  %767 = vmatprep.mubr.msk.f32.mxu1 %vm187_vm5, %v185_v60 }
 0x27a   :  { %v186_v61 = vpop.trf.xlu1 }
 0x27b   :  { %742 = vmatmul.mubr.msk.f32.gmra.mrb[14].mxu0 %vm187_vm5, %v186_v61  ;;  %768 = vmatmul.mubr.msk.f32.gmra.mrb[14].mxu1 %vm187_vm5, %v186_v61 }
 0x27c   :  { %792 = shalt.err (!%p789_p4)
}
 0x27d   :  { %s793_s5 = scalar_lea.hbm %s1250_s4, 16 }
 0x27e   :  { %p794_p5 = scmp.ne.s32.totalorder %s1250_s4, %s793_s5  ;;  %p797_p6 = scmp.lt.u32.totalorder %s793_s5, %s1250_s4 }
 0x280   :  { %p799_p7 = pnand %p797_p6, %p794_p5 }
 0x282   :  { %802 = shalt.err (!%p799_p7)
}
 0x283   :  { %629 = dma.vmem_to_hbm [thread:$0]  %s627_s26, 16, %s1250_s4, [#allocation3]   ;;  %v139_v62 = vld [vmem:[%s1248_s2 + $0x8] sm:$0xff]  ;;  %v138_v0 = vld [vmem:[%s1248_s2] sm:$0xff]  ;;  %v141_v10 = vld [vmem:[%s1248_s2 + $0x18] sm:$0xff] }
 0x284   :  { %v414_v63 = vld [vmem:[%s1249_s3 + $0x8] sm:$0xff]  ;;  %v413_v1 = vld [vmem:[%s1249_s3] sm:$0xff]  ;;  %v416_v11 = vld [vmem:[%s1249_s3 + $0x18] sm:$0xff] }
 0x285   :  { %v140_v12 = vld [vmem:[%s1248_s2 + $0x10] sm:$0xff]  ;;  %v143_v22 = vld [vmem:[%s1248_s2 + $0x28] sm:$0xff]  ;;  %v142_v24 = vld [vmem:[%s1248_s2 + $0x20] sm:$0xff] }
 0x286   :  { %v415_v13 = vld [vmem:[%s1249_s3 + $0x10] sm:$0xff]  ;;  %v418_v23 = vld [vmem:[%s1249_s3 + $0x28] sm:$0xff]  ;;  %v417_v25 = vld [vmem:[%s1249_s3 + $0x20] sm:$0xff] }
 0x287   :  { %v145_v34 = vld [vmem:[%s1248_s2 + $0x38] sm:$0xff]  ;;  %v144_v36 = vld [vmem:[%s1248_s2 + $0x30] sm:$0xff]  ;;  %v147_v46 = vld [vmem:[%s1248_s2 + $0x48] sm:$0xff] }
 0x288   :  { %v420_v35 = vld [vmem:[%s1249_s3 + $0x38] sm:$0xff]  ;;  %v419_v37 = vld [vmem:[%s1249_s3 + $0x30] sm:$0xff]  ;;  %v422_v47 = vld [vmem:[%s1249_s3 + $0x48] sm:$0xff] }
 0x289   :  { %v146_v48 = vld [vmem:[%s1248_s2 + $0x40] sm:$0xff]  ;;  %v149_v58 = vld [vmem:[%s1248_s2 + $0x58] sm:$0xff]  ;;  %v148_v60 = vld [vmem:[%s1248_s2 + $0x50] sm:$0xff] }
 0x28a   :  { %v421_v49 = vld [vmem:[%s1249_s3 + $0x40] sm:$0xff]  ;;  %v424_v59 = vld [vmem:[%s1249_s3 + $0x58] sm:$0xff]  ;;  %v423_v61 = vld [vmem:[%s1249_s3 + $0x50] sm:$0xff] }
 0x316   :  { %v722_v2 = vpop.f32.mrb[0].mxu0  ;;  %v748_v3 = vpop.f32.mrb[0].mxu1 }
 0x317   :  { %v382_v4 = vadd.f32 %v722_v2, %v139_v62  ;;  %v575_v5 = vadd.f32 %v748_v3, %v414_v63  ;;  %v302_v6 = vpop.f32.mrb[1].mxu0  ;;  %v495_v7 = vpop.f32.mrb[1].mxu1 }
 0x318   :  { %v381_v8 = vadd.f32 %v302_v6, %v138_v0  ;;  %v574_v9 = vadd.f32 %v495_v7, %v413_v1  ;;  %v151_v6 = vld [vmem:[%s1248_s2 + $0x68] sm:$0xff] }
 0x319   :  { %398 = vst.msk [vmem:[%s1248_s2 + $0x8] sm:$0xff] %vm53_vm0, %v382_v4  ;;  %591 = vst.msk [vmem:[%s1249_s3 + $0x8] sm:$0xff] %vm53_vm0, %v575_v5  ;;  %v426_v7 = vld [vmem:[%s1249_s3 + $0x68] sm:$0xff] }
 0x31a   :  { %397 = vst.msk [vmem:[%s1248_s2] sm:$0xff] %vm53_vm0, %v381_v8  ;;  %590 = vst.msk [vmem:[%s1249_s3] sm:$0xff] %vm53_vm0, %v574_v9  ;;  %v150_v8 = vld [vmem:[%s1248_s2 + $0x60] sm:$0xff] }
 0x31b   :  { %v425_v9 = vld [vmem:[%s1249_s3 + $0x60] sm:$0xff] }
 0x31e   :  { %v725_v14 = vpop.f32.mrb[2].mxu0  ;;  %v751_v15 = vpop.f32.mrb[2].mxu1 }
 0x31f   :  { %v384_v16 = vadd.f32 %v725_v14, %v141_v10  ;;  %v577_v17 = vadd.f32 %v751_v15, %v416_v11  ;;  %v312_v18 = vpop.f32.mrb[3].mxu0  ;;  %v505_v19 = vpop.f32.mrb[3].mxu1 }
 0x320   :  { %v383_v20 = vadd.f32 %v312_v18, %v140_v12  ;;  %v576_v21 = vadd.f32 %v505_v19, %v415_v13  ;;  %v153_v18 = vld [vmem:[%s1248_s2 + $0x78] sm:$0xff] }
 0x321   :  { %400 = vst.msk [vmem:[%s1248_s2 + $0x18] sm:$0xff] %vm53_vm0, %v384_v16  ;;  %593 = vst.msk [vmem:[%s1249_s3 + $0x18] sm:$0xff] %vm53_vm0, %v577_v17  ;;  %v428_v19 = vld [vmem:[%s1249_s3 + $0x78] sm:$0xff] }
 0x322   :  { %399 = vst.msk [vmem:[%s1248_s2 + $0x10] sm:$0xff] %vm53_vm0, %v383_v20  ;;  %592 = vst.msk [vmem:[%s1249_s3 + $0x10] sm:$0xff] %vm53_vm0, %v576_v21  ;;  %v152_v20 = vld [vmem:[%s1248_s2 + $0x70] sm:$0xff] }
 0x323   :  { %v427_v21 = vld [vmem:[%s1249_s3 + $0x70] sm:$0xff] }
 0x326   :  { %v728_v26 = vpop.f32.mrb[4].mxu0  ;;  %v754_v27 = vpop.f32.mrb[4].mxu1 }
 0x327   :  { %v386_v28 = vadd.f32 %v728_v26, %v143_v22  ;;  %v579_v29 = vadd.f32 %v754_v27, %v418_v23  ;;  %v322_v30 = vpop.f32.mrb[5].mxu0  ;;  %v515_v31 = vpop.f32.mrb[5].mxu1 }
 0x328   :  { %v385_v32 = vadd.f32 %v322_v30, %v142_v24  ;;  %v578_v33 = vadd.f32 %v515_v31, %v417_v25 }
 0x329   :  { %402 = vst.msk [vmem:[%s1248_s2 + $0x28] sm:$0xff] %vm53_vm0, %v386_v28  ;;  %595 = vst.msk [vmem:[%s1249_s3 + $0x28] sm:$0xff] %vm53_vm0, %v579_v29 }
 0x32a   :  { %401 = vst.msk [vmem:[%s1248_s2 + $0x20] sm:$0xff] %vm53_vm0, %v385_v32  ;;  %594 = vst.msk [vmem:[%s1249_s3 + $0x20] sm:$0xff] %vm53_vm0, %v578_v33 }
 0x32e   :  { %v731_v38 = vpop.f32.mrb[6].mxu0  ;;  %v757_v39 = vpop.f32.mrb[6].mxu1 }
 0x32f   :  { %v388_v40 = vadd.f32 %v731_v38, %v145_v34  ;;  %v581_v41 = vadd.f32 %v757_v39, %v420_v35  ;;  %v332_v42 = vpop.f32.mrb[7].mxu0  ;;  %v525_v43 = vpop.f32.mrb[7].mxu1 }
 0x330   :  { %v387_v44 = vadd.f32 %v332_v42, %v144_v36  ;;  %v580_v45 = vadd.f32 %v525_v43, %v419_v37 }
 0x331   :  { %404 = vst.msk [vmem:[%s1248_s2 + $0x38] sm:$0xff] %vm53_vm0, %v388_v40  ;;  %597 = vst.msk [vmem:[%s1249_s3 + $0x38] sm:$0xff] %vm53_vm0, %v581_v41 }
 0x332   :  { %403 = vst.msk [vmem:[%s1248_s2 + $0x30] sm:$0xff] %vm53_vm0, %v387_v44  ;;  %596 = vst.msk [vmem:[%s1249_s3 + $0x30] sm:$0xff] %vm53_vm0, %v580_v45 }
 0x336   :  { %v734_v50 = vpop.f32.mrb[8].mxu0  ;;  %v760_v51 = vpop.f32.mrb[8].mxu1 }
 0x337   :  { %v390_v52 = vadd.f32 %v734_v50, %v147_v46  ;;  %v583_v53 = vadd.f32 %v760_v51, %v422_v47  ;;  %v342_v54 = vpop.f32.mrb[9].mxu0  ;;  %v535_v55 = vpop.f32.mrb[9].mxu1 }
 0x338   :  { %v389_v56 = vadd.f32 %v342_v54, %v146_v48  ;;  %v582_v57 = vadd.f32 %v535_v55, %v421_v49 }
 0x339   :  { %406 = vst.msk [vmem:[%s1248_s2 + $0x48] sm:$0xff] %vm53_vm0, %v390_v52  ;;  %599 = vst.msk [vmem:[%s1249_s3 + $0x48] sm:$0xff] %vm53_vm0, %v583_v53 }
 0x33a   :  { %405 = vst.msk [vmem:[%s1248_s2 + $0x40] sm:$0xff] %vm53_vm0, %v389_v56  ;;  %598 = vst.msk [vmem:[%s1249_s3 + $0x40] sm:$0xff] %vm53_vm0, %v582_v57 }
 0x33e   :  { %v737_v62 = vpop.f32.mrb[10].mxu0  ;;  %v763_v63 = vpop.f32.mrb[10].mxu1 }
 0x33f   :  { %v392_v0 = vadd.f32 %v737_v62, %v149_v58  ;;  %v585_v1 = vadd.f32 %v763_v63, %v424_v59  ;;  %v352_v2 = vpop.f32.mrb[11].mxu0  ;;  %v545_v3 = vpop.f32.mrb[11].mxu1 }
 0x340   :  { %v391_v4 = vadd.f32 %v352_v2, %v148_v60  ;;  %v584_v5 = vadd.f32 %v545_v3, %v423_v61 }
 0x341   :  { %408 = vst.msk [vmem:[%s1248_s2 + $0x58] sm:$0xff] %vm53_vm0, %v392_v0  ;;  %601 = vst.msk [vmem:[%s1249_s3 + $0x58] sm:$0xff] %vm53_vm0, %v585_v1 }
 0x342   :  { %407 = vst.msk [vmem:[%s1248_s2 + $0x50] sm:$0xff] %vm53_vm0, %v391_v4  ;;  %600 = vst.msk [vmem:[%s1249_s3 + $0x50] sm:$0xff] %vm53_vm0, %v584_v5 }
 0x346   :  { %v740_v10 = vpop.f32.mrb[12].mxu0  ;;  %v766_v11 = vpop.f32.mrb[12].mxu1 }
 0x347   :  { %v394_v12 = vadd.f32 %v740_v10, %v151_v6  ;;  %v587_v13 = vadd.f32 %v766_v11, %v426_v7  ;;  %v362_v14 = vpop.f32.mrb[13].mxu0  ;;  %v555_v15 = vpop.f32.mrb[13].mxu1 }
 0x348   :  { %v393_v16 = vadd.f32 %v362_v14, %v150_v8  ;;  %v586_v17 = vadd.f32 %v555_v15, %v425_v9 }
 0x349   :  { %410 = vst.msk [vmem:[%s1248_s2 + $0x68] sm:$0xff] %vm53_vm0, %v394_v12  ;;  %603 = vst.msk [vmem:[%s1249_s3 + $0x68] sm:$0xff] %vm53_vm0, %v587_v13 }
 0x34a   :  { %409 = vst.msk [vmem:[%s1248_s2 + $0x60] sm:$0xff] %vm53_vm0, %v393_v16  ;;  %602 = vst.msk [vmem:[%s1249_s3 + $0x60] sm:$0xff] %vm53_vm0, %v586_v17 }
 0x34e   :  { %v743_v22 = vpop.f32.mrb[14].mxu0  ;;  %v769_v23 = vpop.f32.mrb[14].mxu1 }
 0x34f   :  { %v396_v24 = vadd.f32 %v743_v22, %v153_v18  ;;  %v589_v25 = vadd.f32 %v769_v23, %v428_v19  ;;  %v372_v26 = vpop.f32.mrb[15].mxu0  ;;  %v565_v27 = vpop.f32.mrb[15].mxu1 }
 0x350   :  { %v395_v28 = vadd.f32 %v372_v26, %v152_v20  ;;  %v588_v29 = vadd.f32 %v565_v27, %v427_v21 }
 0x351   :  { %412 = vst.msk [vmem:[%s1248_s2 + $0x78] sm:$0xff] %vm53_vm0, %v396_v24  ;;  %605 = vst.msk [vmem:[%s1249_s3 + $0x78] sm:$0xff] %vm53_vm0, %v589_v25 }
 0x352   :  { %411 = vst.msk [vmem:[%s1248_s2 + $0x70] sm:$0xff] %vm53_vm0, %v395_v28  ;;  %604 = vst.msk [vmem:[%s1249_s3 + $0x70] sm:$0xff] %vm53_vm0, %v588_v29 }
 0x353   :  { %803 = dma.done.wait [#allocation3], 16  }
 0x354   :  { %804 = vsyncadd [#allocation3], 4294967280 }
 0x355   :  { %637 = vsyncpa [#allocation3], 1 }

</bundles_post_ra>
